<compile_context>
chip_gen: v6e
topology: v6e:2x2x1
jax: 0.10.0
libtpu: 0.0.40
codegen_flags: <defaults>
</compile_context>

<pallas_src>
import jax
import jax.numpy as jnp
from jax.experimental import pallas as pl
from jax.experimental.pallas import tpu as pltpu

HID = 128  # padded width for the (VMEM-only) hidden dimensions
_HI = jax.lax.Precision.HIGHEST


def mlp_kernel(x_ref, w1_ref, b1_ref, w2_ref, b2_ref, w3_ref, b3_ref, o_ref):
    x = x_ref[...]                                                    # (tm, 4) narrow read
    h1 = jnp.dot(x, w1_ref[...],
                 preferred_element_type=jnp.float32, precision=_HI) + b1_ref[...]
    h1 = jnp.maximum(h1, 0.0)                                         # ReLU, (tm, 128)
    h2 = jnp.dot(h1, w2_ref[...],
                 preferred_element_type=jnp.float32, precision=_HI) + b2_ref[...]
    h2 = jnp.maximum(h2, 0.0)                                         # ReLU, (tm, 128)
    out = jnp.dot(h2, w3_ref[...],
                  preferred_element_type=jnp.float32, precision=_HI) + b3_ref[...]
    # Narrow store: only the real output columns go back to HBM.
    o_ref[...] = out[:, : o_ref.shape[-1]].astype(o_ref.dtype)


def _pad2(a, rows, cols):
    return jnp.pad(a, ((0, rows - a.shape[0]), (0, cols - a.shape[1])))


def _pick_tile(B, block_rows):
    """Sublane-aligned batch tile; >=2 grid steps once B is non-trivial."""
    if B <= 16:
        return B                       # single block equal to the full array dim (legal)
    half = -(-(-(-B // 2)) // 8) * 8   # ceil(B/2) rounded up to a multiple of 8
    return min(block_rows, half)


def mlp_forward(x, params, *, block_rows=4096):
    """x: (B, in_features). params: (w1, b1, w2, b2, w3, b3), weights (in, out)."""
    w1, b1, w2, b2, w3, b3 = params
    B, d_in = x.shape
    n_out = w3.shape[1]

    # Pad only the tiny weights/biases (hidden dims -> 128). x / output stay narrow.
    w1p, b1p = _pad2(w1, d_in, HID), _pad2(b1, 1, HID)
    w2p, b2p = _pad2(w2, HID, HID), _pad2(b2, 1, HID)
    w3p, b3p = _pad2(w3, HID, HID), _pad2(b3, 1, HID)

    tm = _pick_tile(B, block_rows)
    n_blocks = pl.cdiv(B, tm)

    resident = lambda shape: pl.BlockSpec(shape, lambda i: (0, 0))  # weights stay in VMEM

    return pl.pallas_call(
        mlp_kernel,
        out_shape=jax.ShapeDtypeStruct((B, n_out), jnp.float32),
        grid=(n_blocks,),
        in_specs=[
            pl.BlockSpec((tm, d_in), lambda i: (i, 0)),   # narrow x tile (last dim == full dim)
            resident((d_in, HID)), resident((1, HID)),    # w1, b1
            resident((HID, HID)), resident((1, HID)),     # w2, b2
            resident((HID, HID)), resident((1, HID)),     # w3, b3
        ],
        out_specs=pl.BlockSpec((tm, n_out), lambda i: (i, 0)),   # narrow (tm, 3) output tile
        compiler_params=pltpu.CompilerParams(
            dimension_semantics=("parallel",),            # shard batch grid over v7x's 2 TCs
            vmem_limit_bytes=48 * 1024 * 1024,            # room for big tiles, < v7x 64 MiB
        ),
    )(x, w1p, b1p, w2p, b2p, w3p, b3p)


def init_params(key, in_features=4, hl1=7, hl2=8, classification=3):
    # Deterministic init mimicking nn.Linear (uniform in +/- 1/sqrt(fan_in)).
    ks = jax.random.split(key, 6)

    def lin(kw, kb, fan_in, fan_out):
        bound = 1.0 / jnp.sqrt(fan_in)
        w = jax.random.uniform(kw, (fan_in, fan_out), jnp.float32, -bound, bound)
        b = jax.random.uniform(kb, (1, fan_out), jnp.float32, -bound, bound)
        return w, b

    w1, b1 = lin(ks[0], ks[1], in_features, hl1)
    w2, b2 = lin(ks[2], ks[3], hl1, hl2)
    w3, b3 = lin(ks[4], ks[5], hl2, classification)
    return (w1, b1, w2, b2, w3, b3)


def reference_forward(x, params):
    w1, b1, w2, b2, w3, b3 = params
    h1 = jnp.maximum(jnp.dot(x, w1, precision=_HI) + b1, 0.0)
    h2 = jnp.maximum(jnp.dot(h1, w2, precision=_HI) + b2, 0.0)
    return jnp.dot(h2, w3, precision=_HI) + b3


if __name__ == "__main__":
    key = jax.random.PRNGKey(0)
    kx, kp = jax.random.split(key)
    batch = 8
    x = jax.random.normal(kx, (batch, 4), jnp.float32)
    params = init_params(kp)

    out = jax.jit(mlp_forward)(x, params)
    out = jax.block_until_ready(out)

    ref = reference_forward(x, params)
    assert out.shape == (batch, 3)
    assert jnp.allclose(out, ref, atol=1e-5, rtol=1e-5)
    print("KERNEL_OK")
</pallas_src>

<mosaic_0001>
module attributes {stable_mosaic.version = 11 : i64} {
  func.func @mlp_kernel(%arg0: i32, %arg1: memref<8x4xf32, #tpu.memory_space<vmem>>, %arg2: memref<4x128xf32, #tpu.memory_space<vmem>>, %arg3: memref<1x128xf32, #tpu.memory_space<vmem>>, %arg4: memref<128x128xf32, #tpu.memory_space<vmem>>, %arg5: memref<1x128xf32, #tpu.memory_space<vmem>>, %arg6: memref<128x128xf32, #tpu.memory_space<vmem>>, %arg7: memref<1x128xf32, #tpu.memory_space<vmem>>, %arg8: memref<8x3xf32, #tpu.memory_space<vmem>>) attributes {dimension_semantics = [#tpu.dimension_semantics<parallel>], iteration_bounds = array<i64: 1>, scalar_prefetch = 0 : i64, scratch_operands = 0 : i64, tpu.core_type = #tpu.core_type<tc>, window_params = [{transform_indices = @transform_0, window_bounds = array<i64: 8, 4>}, {pipeline_mode = #tpu.pipeline_mode<synchronous>, transform_indices = @transform_1, window_bounds = array<i64: 4, 128>}, {pipeline_mode = #tpu.pipeline_mode<synchronous>, transform_indices = @transform_2, window_bounds = array<i64: 1, 128>}, {pipeline_mode = #tpu.pipeline_mode<synchronous>, transform_indices = @transform_3, window_bounds = array<i64: 128, 128>}, {pipeline_mode = #tpu.pipeline_mode<synchronous>, transform_indices = @transform_4, window_bounds = array<i64: 1, 128>}, {pipeline_mode = #tpu.pipeline_mode<synchronous>, transform_indices = @transform_5, window_bounds = array<i64: 128, 128>}, {pipeline_mode = #tpu.pipeline_mode<synchronous>, transform_indices = @transform_6, window_bounds = array<i64: 1, 128>}, {transform_indices = @transform_7, window_bounds = array<i64: 8, 3>}]} {
    %c0 = arith.constant 0 : index
    %c0_0 = arith.constant 0 : index
    %0 = vector.load %arg1[%c0, %c0_0] : memref<8x4xf32, #tpu.memory_space<vmem>>, vector<8x4xf32>
    %c0_1 = arith.constant 0 : index
    %c0_2 = arith.constant 0 : index
    %1 = vector.load %arg2[%c0_1, %c0_2] : memref<4x128xf32, #tpu.memory_space<vmem>>, vector<4x128xf32>
    %cst = arith.constant dense<0.000000e+00> : vector<8x128xf32>
    %2 = tpu.matmul %0, %1, %cst {dimension_numbers = #tpu.dot_dimension_numbers<[1], [0], [0], [1], [0, 0, 1, 1], [], []>, precision = #tpu.contract_precision<fp32>} : vector<8x4xf32>, vector<4x128xf32>, vector<8x128xf32> -> vector<8x128xf32>
    %c0_3 = arith.constant 0 : index
    %c0_4 = arith.constant 0 : index
    %3 = vector.load %arg3[%c0_3, %c0_4] : memref<1x128xf32, #tpu.memory_space<vmem>>, vector<1x128xf32>
    %4 = vector.broadcast %3 : vector<1x128xf32> to vector<8x128xf32>
    %5 = arith.addf %2, %4 : vector<8x128xf32>
    %cst_5 = arith.constant 0.000000e+00 : f32
    %6 = vector.broadcast %cst_5 : f32 to vector<8x128xf32>
    %7 = arith.maximumf %5, %6 : vector<8x128xf32>
    %c0_6 = arith.constant 0 : index
    %c0_7 = arith.constant 0 : index
    %8 = vector.load %arg4[%c0_6, %c0_7] : memref<128x128xf32, #tpu.memory_space<vmem>>, vector<128x128xf32>
    %cst_8 = arith.constant dense<0.000000e+00> : vector<8x128xf32>
    %9 = tpu.matmul %7, %8, %cst_8 {dimension_numbers = #tpu.dot_dimension_numbers<[1], [0], [0], [1], [0, 0, 1, 1], [], []>, precision = #tpu.contract_precision<fp32>} : vector<8x128xf32>, vector<128x128xf32>, vector<8x128xf32> -> vector<8x128xf32>
    %c0_9 = arith.constant 0 : index
    %c0_10 = arith.constant 0 : index
    %10 = vector.load %arg5[%c0_9, %c0_10] : memref<1x128xf32, #tpu.memory_space<vmem>>, vector<1x128xf32>
    %11 = vector.broadcast %10 : vector<1x128xf32> to vector<8x128xf32>
    %12 = arith.addf %9, %11 : vector<8x128xf32>
    %cst_11 = arith.constant 0.000000e+00 : f32
    %13 = vector.broadcast %cst_11 : f32 to vector<8x128xf32>
    %14 = arith.maximumf %12, %13 : vector<8x128xf32>
    %c0_12 = arith.constant 0 : index
    %c0_13 = arith.constant 0 : index
    %15 = vector.load %arg6[%c0_12, %c0_13] : memref<128x128xf32, #tpu.memory_space<vmem>>, vector<128x128xf32>
    %cst_14 = arith.constant dense<0.000000e+00> : vector<8x128xf32>
    %16 = tpu.matmul %14, %15, %cst_14 {dimension_numbers = #tpu.dot_dimension_numbers<[1], [0], [0], [1], [0, 0, 1, 1], [], []>, precision = #tpu.contract_precision<fp32>} : vector<8x128xf32>, vector<128x128xf32>, vector<8x128xf32> -> vector<8x128xf32>
    %c0_15 = arith.constant 0 : index
    %c0_16 = arith.constant 0 : index
    %17 = vector.load %arg7[%c0_15, %c0_16] : memref<1x128xf32, #tpu.memory_space<vmem>>, vector<1x128xf32>
    %18 = vector.broadcast %17 : vector<1x128xf32> to vector<8x128xf32>
    %19 = arith.addf %16, %18 : vector<8x128xf32>
    %20 = vector.extract_strided_slice %19 {offsets = [0, 0], sizes = [8, 3], strides = [1, 1]} : vector<8x128xf32> to vector<8x3xf32>
    %c0_17 = arith.constant 0 : index
    %c0_18 = arith.constant 0 : index
    %21 = vector.load %arg8[%c0_17, %c0_18] : memref<8x3xf32, #tpu.memory_space<vmem>>, vector<8x3xf32>
    tpu.vector_store %arg8[%c0_17, %c0_18], %20 {strides = array<i32>} : memref<8x3xf32, #tpu.memory_space<vmem>>, vector<8x3xf32>,
    return
  }
  func.func @transform_0(%arg0: i32) -> (i32, i32) {
    %c0_i32 = arith.constant 0 : i32
    %c0_i32_0 = arith.constant 0 : i32
    return %arg0, %c0_i32 : i32, i32
  }
  func.func @transform_1(%arg0: i32) -> (i32, i32) {
    %c0_i32 = arith.constant 0 : i32
    %c0_i32_0 = arith.constant 0 : i32
    %c0_i32_1 = arith.constant 0 : i32
    return %c0_i32, %c0_i32_0 : i32, i32
  }
  func.func @transform_2(%arg0: i32) -> (i32, i32) {
    %c0_i32 = arith.constant 0 : i32
    %c0_i32_0 = arith.constant 0 : i32
    %c0_i32_1 = arith.constant 0 : i32
    return %c0_i32, %c0_i32_0 : i32, i32
  }
  func.func @transform_3(%arg0: i32) -> (i32, i32) {
    %c0_i32 = arith.constant 0 : i32
    %c0_i32_0 = arith.constant 0 : i32
    %c0_i32_1 = arith.constant 0 : i32
    return %c0_i32, %c0_i32_0 : i32, i32
  }
  func.func @transform_4(%arg0: i32) -> (i32, i32) {
    %c0_i32 = arith.constant 0 : i32
    %c0_i32_0 = arith.constant 0 : i32
    %c0_i32_1 = arith.constant 0 : i32
    return %c0_i32, %c0_i32_0 : i32, i32
  }
  func.func @transform_5(%arg0: i32) -> (i32, i32) {
    %c0_i32 = arith.constant 0 : i32
    %c0_i32_0 = arith.constant 0 : i32
    %c0_i32_1 = arith.constant 0 : i32
    return %c0_i32, %c0_i32_0 : i32, i32
  }
  func.func @transform_6(%arg0: i32) -> (i32, i32) {
    %c0_i32 = arith.constant 0 : i32
    %c0_i32_0 = arith.constant 0 : i32
    %c0_i32_1 = arith.constant 0 : i32
    return %c0_i32, %c0_i32_0 : i32, i32
  }
  func.func @transform_7(%arg0: i32) -> (i32, i32) {
    %c0_i32 = arith.constant 0 : i32
    %c0_i32_0 = arith.constant 0 : i32
    return %arg0, %c0_i32 : i32, i32
  }
}

</mosaic_0001>

<bundles_post_ra>
// kernel: mlp_forward.1
= control target key start
LH: loop header
LB: loop body
LE: loop exit
PB: predicated region body
PF: predicated region fallthrough
CT: control target
= control target key end

     0   :  { %vm39_vm0 = vcmask 1043456   ;;  %vm35_vm1 = vcmask 31744   ;;  %v2496_v0 = vmov 0.0   ;;  %vm2497_vm2 = vmmov 0   ;;  %s3394_s1 = inlined_call_operand.vmem [shape: f32[4,128], index: 1, kind: input, shape index: {}]   ;;  %s3395_s0 = inlined_call_operand.vmem [shape: f32[8,4], index: 0, kind: input, shape index: {}]   ;;  %s3396_s3 = inlined_call_operand.vmem [shape: f32[128,128], index: 3, kind: input, shape index: {}]   ;;  %s3397_s2 = inlined_call_operand.vmem [shape: f32[1,128], index: 2, kind: input, shape index: {}]   ;;  %s3398_s5 = inlined_call_operand.vmem [shape: f32[128,128], index: 5, kind: input, shape index: {}]   ;;  %s3399_s4 = inlined_call_operand.vmem [shape: f32[1,128], index: 4, kind: input, shape index: {}]   ;;  %s3400_s6 = inlined_call_operand.vmem [shape: f32[1,128], index: 6, kind: input, shape index: {}]   ;;  %s3401_s7 = inlined_call_operand.vmem [shape: f32[8,3], index: 7, kind: output, shape index: {}]  }
   0x1   :  { %2044 = vmatprep.subr.mxu0 %v2496_v0  ;;  %v27_v1 = vld [vmem:[%s3394_s1] sm:$0xf]  ;;  %2046 = vmatprep.mubr.msk.f32.mxu0 %vm2497_vm2, %v2496_v0  ;;  %v505_v3 = vld [vmem:[%s3396_s3 + $0x78] sm:$0xff]  ;;  %v504_v6 = vld [vmem:[%s3396_s3 + $0x70] sm:$0xff]  ;;  %vm1819_vm3 = vcmask 23552  }
   0x2   :  { %v26_v2 = vld [vmem:[%s3395_s0] sm:$0xff]  ;;  %v41_v4 = vsel %vm39_vm0, %v27_v1, 0  ;;  %2049 = vmatprep.subr.mxu1 %v2496_v0  ;;  %2051 = vmatprep.mubr.msk.f32.mxu1 %vm2497_vm2, %v2496_v0  ;;  %v2558_v9 = vand.u32 4294901760, %v505_v3  ;;  %v503_v10 = vld [vmem:[%s3396_s3 + $0x68] sm:$0xff]  ;;  %v2564_v13 = vand.u32 4294901760, %v504_v6  ;;  %v501_v19 = vld [vmem:[%s3396_s3 + $0x58] sm:$0xff] }
   0x3   :  { %v37_v5 = vsel %vm35_vm1, %v26_v2, 0  ;;  %v74_v7 = vand.u32 4294901760, %v41_v4  ;;  %v502_v14 = vld [vmem:[%s3396_s3 + $0x60] sm:$0xff]  ;;  %v2573_v18 = vand.u32 4294901760, %v503_v10  ;;  %v2583_v24 = vand.u32 4294901760, %v501_v19  ;;  %v500_v25 = vld [vmem:[%s3396_s3 + $0x50] sm:$0xff] }
   0x4   :  { %v2556_v8 = vand.u32 4294901760, %v37_v5  ;;  %v2571_v17 = vsub.f32 %v505_v3, %v2558_v9  ;;  %v2579_v22 = vsub.f32 %v504_v6, %v2564_v13  ;;  %v2581_v23 = vand.u32 4294901760, %v502_v14  ;;  %v499_v30 = vld [vmem:[%s3396_s3 + $0x48] sm:$0xff]  ;;  %v498_v34 = vld [vmem:[%s3396_s3 + $0x40] sm:$0xff]  ;;  %v497_v63 = vld [vmem:[%s3396_s3 + $0x38] sm:$0xff] }
   0x5   :  { %2045 = vmatpush3.msra.mxu0 %v74_v7  ;;  %v151_v12 = vsub.f32 %v41_v4, %v74_v7  ;;  %v2590_v29 = vsub.f32 %v503_v10, %v2573_v18  ;;  %v2599_v33 = vand.u32 4294901760, %v500_v25  ;;  %v2613_v37 = vsub.f32 %v501_v19, %v2583_v24  ;;  %v496_v2 = vld [vmem:[%s3396_s3 + $0x30] sm:$0xff]  ;;  %v494_v10 = vld [vmem:[%s3396_s3 + $0x20] sm:$0xff] }
   0x6   :  { %v110_v11 = vsub.f32 %v37_v5, %v2556_v8  ;;  %2054 = vmatprep.subr.mxu0 %v2496_v0  ;;  %v607_v28 = vand.u32 4294901760, %v2571_v17  ;;  %v614_v31 = vand.u32 4294901760, %v2579_v22  ;;  %v2597_v32 = vsub.f32 %v502_v14, %v2581_v23  ;;  %v495_v5 = vld [vmem:[%s3396_s3 + $0x28] sm:$0xff] }
   0x7   :  { %v152_v16 = vand.u32 4294901760, %v151_v12  ;;  %v621_v36 = vand.u32 4294901760, %v2590_v29  ;;  %v2615_v38 = vand.u32 4294901760, %v499_v30  ;;  %v2625_v41 = vsub.f32 %v500_v25, %v2599_v33 }
   0x8   :  { %v111_v15 = vand.u32 4294901760, %v110_v11  ;;  %v608_v35 = vsub.f32 %v2571_v17, %v607_v28  ;;  %v615_v39 = vsub.f32 %v2579_v22, %v614_v31  ;;  %v628_v40 = vand.u32 4294901760, %v2597_v32 }
   0x9   :  { %v153_v21 = vsub.f32 %v151_v12, %v152_v16  ;;  %v2627_v42 = vand.u32 4294901760, %v498_v34  ;;  %v622_v44 = vsub.f32 %v2590_v29, %v621_v36  ;;  %v635_v45 = vand.u32 4294901760, %v2613_v37 }
   0xa   :  { %v112_v20 = vsub.f32 %v110_v11, %v111_v15  ;;  %v609_v43 = vand.u32 4294901760, %v608_v35  ;;  %v2637_v46 = vsub.f32 %v499_v30, %v2615_v38  ;;  %v616_v47 = vand.u32 4294901760, %v615_v39 }
   0xb   :  { %v154_v27 = vand.u32 4294901760, %v153_v21  ;;  %v629_v48 = vsub.f32 %v2597_v32, %v628_v40  ;;  %v642_v49 = vand.u32 4294901760, %v2625_v41  ;;  %v2648_v50 = vsub.f32 %v498_v34, %v2627_v42 }
   0xc   :  { %v113_v26 = vand.u32 4294901760, %v112_v20  ;;  %v623_v51 = vand.u32 4294901760, %v622_v44  ;;  %v636_v52 = vsub.f32 %v2613_v37, %v635_v45  ;;  %v649_v53 = vand.u32 4294901760, %v2637_v46  ;;  %v491_v44 = vld [vmem:[%s3396_s3 + $0x8] sm:$0xff] }
   0xd   :  { %2050 = vmatpush3.msra.mxu1 %v154_v27  ;;  %v630_v54 = vand.u32 4294901760, %v629_v48  ;;  %v643_v55 = vsub.f32 %v2625_v41, %v642_v49  ;;  %v656_v56 = vand.u32 4294901760, %v2648_v50  ;;  %v2697_v1 = vand.u32 4294901760, %v497_v63  ;;  %v492_v27 = vld [vmem:[%s3396_s3 + $0x10] sm:$0xff] }
   0xe   :  { %2047 = vmatmul.mubr.f32.vlgmr.msra.gmra.mxu0 %v113_v26  ;;  %2052 = vmatmul.mubr.f32.vlgmr.msra.gmra.mxu1 %v2556_v8  ;;  %v637_v57 = vand.u32 4294901760, %v636_v52  ;;  %v650_v58 = vsub.f32 %v2637_v46, %v649_v53  ;;  %v2705_v4 = vand.u32 4294901760, %v496_v2  ;;  %v2755_v39 = vand.u32 4294901760, %v492_v27 }
   0xf   :  { %2055 = vmatpush3.msra.mxu0 %v151_v12  ;;  %2059 = vmatprep.subr.mxu1 %v2496_v0  ;;  %v644_v59 = vand.u32 4294901760, %v643_v55  ;;  %v657_v60 = vsub.f32 %v2648_v50, %v656_v56  ;;  %v2703_v3 = vsub.f32 %v497_v63, %v2697_v1  ;;  %v2771_v52 = vand.u32 4294901760, %v491_v44  ;;  %v490_v55 = vld [vmem:[%s3396_s3] sm:$0xff] }
  0x10   :  { %2056 = vmatprep.mubr.msk.f32.mxu0 %vm2497_vm2, %v2496_v0  ;;  %2060 = vmatpush3.msra.mxu1 %v74_v7  ;;  %v651_v61 = vand.u32 4294901760, %v650_v58 }
  0x11   :  { %2064 = vmatprep.subr.mxu0 %v2496_v0  ;;  %2061 = vmatprep.mubr.msk.f32.mxu1 %vm2497_vm2, %v2496_v0  ;;  %v658_v62 = vand.u32 4294901760, %v657_v60  ;;  %v663_v6 = vand.u32 4294901760, %v2703_v3  ;;  %v2784_v60 = vand.u32 4294901760, %v490_v55 }
  0x12   :  { %2057 = vmatmul.mubr.f32.vlgmr.msra.gmra.mxu0 %v110_v11  ;;  %2062 = vmatmul.mubr.f32.vlgmr.msra.gmra.mxu1 %v111_v15  ;;  %v2730_v15 = vand.u32 4294901760, %v494_v10 }
  0x13   :  { %2065 = vmatpush3.msra.mxu0 %v152_v16  ;;  %2069 = vmatprep.subr.mxu1 %v2496_v0  ;;  %v664_v11 = vsub.f32 %v2703_v3, %v663_v6  ;;  %v493_v16 = vld [vmem:[%s3396_s3 + $0x18] sm:$0xff] }
  0x14   :  { %2066 = vmatprep.mubr.msk.f32.mxu0 %vm2497_vm2, %v2496_v0  ;;  %2070 = vmatpush3.msra.mxu1 %v74_v7  ;;  %v2714_v7 = vsub.f32 %v496_v2, %v2705_v4  ;;  %v2742_v25 = vsub.f32 %v494_v10, %v2730_v15  ;;  %v2745_v26 = vand.u32 4294901760, %v493_v16  ;;  %v2797_v2 = vsub.f32 %v490_v55, %v2784_v60 }
  0x15   :  { %2071 = vmatprep.mubr.msk.f32.mxu1 %vm2497_vm2, %v2496_v0  ;;  %2109 = vmatprep.subr.mxu1 %v2496_v0  ;;  %v665_v19 = vand.u32 4294901760, %v664_v11 }
  0x16   :  { %2067 = vmatmul.mubr.f32.vlgmr.msra.gmra.mxu0 %v2556_v8  ;;  %2072 = vmatmul.mubr.f32.vlgmr.msra.gmra.mxu1 %v2556_v8  ;;  %v2716_v8 = vand.u32 4294901760, %v495_v5  ;;  %v670_v12 = vand.u32 4294901760, %v2714_v7  ;;  %v3406_v35 = vand.u32 4294901760, %v2742_v25 }
  0x17   :  { %2074 = vmatprep.subr.mxu0 %v2496_v0  ;;  %2110 = vmatpush3.msra.mxu1 %v609_v43  ;;  %v2759_v43 = vsub.f32 %v493_v16, %v2745_v26  ;;  %v3402_v16 = vand.u32 4294901760, %v2797_v2 }
  0x18   :  { %2075 = vmatpush3.msra.mxu0 %v2558_v9  ;;  %2111 = vmatprep.subr.mxu1 %v2496_v0  ;;  %v2728_v14 = vsub.f32 %v495_v5, %v2716_v8  ;;  %v671_v20 = vsub.f32 %v2714_v7, %v670_v12  ;;  %v685_v48 = vsub.f32 %v2742_v25, %v3406_v35 }
  0x19   :  { %2076 = vmatprep.subr.mxu0 %v2496_v0  ;;  %2112 = vmatpush3.msra.mxu1 %v616_v47 }
  0x1a   :  { %2077 = vmatpush3.msra.mxu0 %v2564_v13  ;;  %2113 = vmatprep.subr.mxu1 %v2496_v0  ;;  %v3407_v21 = vand.u32 4294901760, %v2728_v14  ;;  %v672_v30 = vand.u32 4294901760, %v671_v20  ;;  %v713_v20 = vsub.f32 %v2797_v2, %v3402_v16 }
  0x1b   :  { %2078 = vmatprep.subr.mxu0 %v2496_v0  ;;  %2114 = vmatpush3.msra.mxu1 %v623_v51  ;;  %v2769_v51 = vsub.f32 %v492_v27, %v2755_v39 }
  0x1c   :  { %2079 = vmatpush3.msra.mxu0 %v2573_v18  ;;  %2115 = vmatprep.subr.mxu1 %v2496_v0  ;;  %v678_v34 = vsub.f32 %v2728_v14, %v3407_v21  ;;  %v714_v27 = vand.u32 4294901760, %v713_v20 }
  0x1d   :  { %2080 = vmatprep.subr.mxu0 %v2496_v0  ;;  %2116 = vmatpush3.msra.mxu1 %v630_v54  ;;  %v3405_v54 = vand.u32 4294901760, %v2759_v43  ;;  %v3404_v58 = vand.u32 4294901760, %v2769_v51 }
  0x1e   :  { %2081 = vmatpush3.msra.mxu0 %v2581_v23  ;;  %2117 = vmatprep.subr.mxu1 %v2496_v0  ;;  %v679_v47 = vand.u32 4294901760, %v678_v34 }
  0x1f   :  { %2082 = vmatprep.subr.mxu0 %v2496_v0  ;;  %2118 = vmatpush3.msra.mxu1 %v637_v57  ;;  %v686_v57 = vand.u32 4294901760, %v685_v48 }
  0x20   :  { %2083 = vmatpush3.msra.mxu0 %v2583_v24  ;;  %2119 = vmatprep.subr.mxu1 %v2496_v0 }
  0x21   :  { %2084 = vmatprep.subr.mxu0 %v2496_v0  ;;  %2120 = vmatpush3.msra.mxu1 %v644_v59  ;;  %v2782_v59 = vsub.f32 %v491_v44, %v2771_v52 }
  0x22   :  { %2085 = vmatpush3.msra.mxu0 %v2599_v33  ;;  %2121 = vmatprep.subr.mxu1 %v2496_v0 }
  0x23   :  { %2086 = vmatprep.subr.mxu0 %v2496_v0  ;;  %2122 = vmatpush3.msra.mxu1 %v651_v61  ;;  %v692_v61 = vsub.f32 %v2759_v43, %v3405_v54  ;;  %v3403_v63 = vand.u32 4294901760, %v2782_v59 }
  0x24   :  { %2087 = vmatpush3.msra.mxu0 %v2615_v38  ;;  %2123 = vmatprep.subr.mxu1 %v2496_v0 }
  0x25   :  { %2088 = vmatprep.subr.mxu0 %v2496_v0  ;;  %2124 = vmatpush3.msra.mxu1 %v658_v62  ;;  %v699_v62 = vsub.f32 %v2769_v51, %v3404_v58  ;;  %v693_v5 = vand.u32 4294901760, %v692_v61  ;;  %v706_v11 = vsub.f32 %v2782_v59, %v3403_v63 }
  0x26   :  { %2089 = vmatpush3.msra.mxu0 %v2627_v42  ;;  %2125 = vmatprep.subr.mxu1 %v2496_v0 }
  0x27   :  { %2090 = vmatprep.subr.mxu0 %v2496_v0  ;;  %2141 = vmatprep.mubr.msk.f32.mxu1 %vm2497_vm2, %v2496_v0  ;;  %v700_v10 = vand.u32 4294901760, %v699_v62 }
  0x28   :  { %2106 = vmatprep.mubr.msk.f32.mxu0 %vm2497_vm2, %v2496_v0  ;;  %2091 = vmatpush3.msra.mxu0 %v2697_v1 }
  0x29   :  { %2092 = vmatprep.subr.mxu0 %v2496_v0  ;;  %2126 = vmatpush3.msra.mxu1 %v665_v19  ;;  %v707_v19 = vand.u32 4294901760, %v706_v11 }
  0x2a   :  { %2093 = vmatpush3.msra.mxu0 %v2705_v4  ;;  %2127 = vmatprep.subr.mxu1 %v2496_v0 }
  0x2b   :  { %2094 = vmatprep.subr.mxu0 %v2496_v0  ;;  %2128 = vmatpush3.msra.mxu1 %v672_v30  ;;  %v1825_v30 = vld [vmem:[%s3397_s2] ss:$0 sm:$0xff] }
  0x2c   :  { %2095 = vmatpush3.msra.mxu0 %v2716_v8  ;;  %2129 = vmatprep.subr.mxu1 %v2496_v0 }
  0x2d   :  { %2096 = vmatprep.subr.mxu0 %v2496_v0  ;;  %2130 = vmatpush3.msra.mxu1 %v679_v47 }
  0x2e   :  { %2097 = vmatpush3.msra.mxu0 %v2730_v15  ;;  %2131 = vmatprep.subr.mxu1 %v2496_v0 }
  0x2f   :  { %2098 = vmatprep.subr.mxu0 %v2496_v0  ;;  %2132 = vmatpush3.msra.mxu1 %v686_v57 }
  0x30   :  { %2099 = vmatpush3.msra.mxu0 %v2745_v26  ;;  %2133 = vmatprep.subr.mxu1 %v2496_v0 }
  0x31   :  { %2100 = vmatprep.subr.mxu0 %v2496_v0  ;;  %2134 = vmatpush3.msra.mxu1 %v693_v5 }
  0x32   :  { %2101 = vmatpush3.msra.mxu0 %v2755_v39  ;;  %2135 = vmatprep.subr.mxu1 %v2496_v0 }
  0x33   :  { %2102 = vmatprep.subr.mxu0 %v2496_v0  ;;  %2136 = vmatpush3.msra.mxu1 %v700_v10 }
  0x34   :  { %2103 = vmatpush3.msra.mxu0 %v2771_v52  ;;  %2137 = vmatprep.subr.mxu1 %v2496_v0 }
  0x35   :  { %2104 = vmatprep.subr.mxu0 %v2496_v0  ;;  %2138 = vmatpush3.msra.mxu1 %v707_v19 }
  0x36   :  { %2105 = vmatpush3.msra.mxu0 %v2784_v60  ;;  %2139 = vmatprep.subr.mxu1 %v2496_v0 }
  0x37   :  { %2144 = vmatprep.subr.mxu0 %v2496_v0  ;;  %2140 = vmatpush3.msra.mxu1 %v714_v27 }
  0x38   :  { %2179 = vmatprep.subr.mxu1 %v2496_v0 }
  0xce   :  { %v115_v34 = vpop.f32.mrf.mxu0  ;;  %v191_v47 = vpop.f32.mrf.mxu1 }
  0xcf   :  { %v116_v44 = vadd.f32 %v1825_v30, %v115_v34 }
  0xd0   :  { %v2048_v48 = vpop.f32.mrf.mxu0  ;;  %v2053_v57 = vpop.f32.mrf.mxu1 }
  0xd1   :  { %v192_v55 = vadd.f32 %v191_v47, %v116_v44  ;;  %v1162_v57 = vld [vmem:[%s3398_s5 + $0x38] sm:$0xff] }
  0xd2   :  { %v265_v61 = vpop.f32.mrf.mxu0  ;;  %v339_v5 = vpop.f32.mrf.mxu1 }
  0xd3   :  { %v266_v62 = vadd.f32 %v265_v61, %v192_v55 }
  0xd4   :  { %v2058_v10 = vpop.f32.mrf.mxu0  ;;  %v2063_v19 = vpop.f32.mrf.mxu1 }
  0xd5   :  { %v340_v11 = vadd.f32 %v339_v5, %v266_v62  ;;  %v3100_v5 = vand.u32 4294901760, %v1162_v57  ;;  %v1161_v10 = vld [vmem:[%s3398_s5 + $0x30] sm:$0xff] }
  0xd6   :  { %v413_v20 = vpop.f32.mrf.mxu0  ;;  %v485_v16 = vpop.f32.mrf.mxu1 }
  0xd7   :  { %v414_v27 = vadd.f32 %v413_v20, %v340_v11  ;;  %v3109_v19 = vsub.f32 %v1162_v57, %v3100_v5  ;;  %v3111_v20 = vand.u32 4294901760, %v1161_v10 }
  0xd8   :  { %v2068_v63 = vpop.f32.mrf.mxu0  ;;  %v2073_v54 = vpop.f32.mrf.mxu1 }
  0xd9   :  { %v486_v58 = vadd.f32 %v485_v16, %v414_v27  ;;  %v1160_v27 = vld [vmem:[%s3398_s5 + $0x28] sm:$0xff] }
  0xdb   :  { %v489_v35 = vmax.f32 %v486_v58, 0.0 }
  0xdd   :  { %v2817_v21 = vand.u32 4294901760, %v489_v35 }
  0xdf   :  { %v2820_v30 = vsub.f32 %v489_v35, %v2817_v21  ;;  %2142 = vmatmul.mubr.f32.vlgmr.msra.gmra.mxu1 %v2817_v21 }
  0xe0   :  { %2180 = vmatpush3.msra.mxu1 %v2558_v9  ;;  %2211 = vmatprep.mubr.msk.f32.mxu1 %vm2497_vm2, %v2496_v0 }
  0xe1   :  { %v596_v34 = vand.u32 4294901760, %v2820_v30  ;;  %2181 = vmatprep.subr.mxu1 %v2496_v0 }
  0xe2   :  { %2182 = vmatpush3.msra.mxu1 %v2564_v13 }
  0xe3   :  { %v597_v54 = vsub.f32 %v2820_v30, %v596_v34  ;;  %2183 = vmatprep.subr.mxu1 %v2496_v0 }
  0xe4   :  { %2184 = vmatpush3.msra.mxu1 %v2573_v18 }
  0xe5   :  { %2185 = vmatprep.subr.mxu1 %v2496_v0  ;;  %v598_v35 = vand.u32 4294901760, %v597_v54  ;;  %v3121_v54 = vsub.f32 %v1161_v10, %v3111_v20 }
  0xe6   :  { %2186 = vmatpush3.msra.mxu1 %v2581_v23 }
  0xe7   :  { %2187 = vmatprep.subr.mxu1 %v2496_v0  ;;  %2107 = vmatmul.mubr.f32.vlgmr.msra.gmra.mxu0 %v598_v35  ;;  %v3123_v35 = vand.u32 4294901760, %v1160_v27 }
  0xe8   :  { %2145 = vmatpush3.msra.mxu0 %v2571_v17  ;;  %2188 = vmatpush3.msra.mxu1 %v2583_v24  ;;  %v3414_v17 = vand.u32 4294901760, %v2759_v43 }
  0xe9   :  { %2146 = vmatprep.subr.mxu0 %v2496_v0  ;;  %2189 = vmatprep.subr.mxu1 %v2496_v0 }
  0xea   :  { %2147 = vmatpush3.msra.mxu0 %v2579_v22  ;;  %2190 = vmatpush3.msra.mxu1 %v2599_v33  ;;  %v3416_v22 = vand.u32 4294901760, %v2782_v59 }
  0xeb   :  { %2148 = vmatprep.subr.mxu0 %v2496_v0  ;;  %2191 = vmatprep.subr.mxu1 %v2496_v0 }
  0xec   :  { %2149 = vmatpush3.msra.mxu0 %v2590_v29  ;;  %2192 = vmatpush3.msra.mxu1 %v2615_v38  ;;  %v1169_v29 = vld [vmem:[%s3398_s5 + $0x70] sm:$0xff] }
  0xed   :  { %2150 = vmatprep.subr.mxu0 %v2496_v0  ;;  %2193 = vmatprep.subr.mxu1 %v2496_v0 }
  0xee   :  { %2151 = vmatpush3.msra.mxu0 %v2597_v32  ;;  %2194 = vmatpush3.msra.mxu1 %v2627_v42  ;;  %v2995_v32 = vand.u32 4294901760, %v1169_v29 }
  0xef   :  { %2152 = vmatprep.subr.mxu0 %v2496_v0  ;;  %2195 = vmatprep.subr.mxu1 %v2496_v0 }
  0xf0   :  { %2153 = vmatpush3.msra.mxu0 %v2613_v37  ;;  %2196 = vmatpush3.msra.mxu1 %v2697_v1  ;;  %v1166_v37 = vld [vmem:[%s3398_s5 + $0x58] sm:$0xff] }
  0xf1   :  { %2154 = vmatprep.subr.mxu0 %v2496_v0  ;;  %2197 = vmatprep.subr.mxu1 %v2496_v0 }
  0xf2   :  { %2155 = vmatpush3.msra.mxu0 %v2625_v41  ;;  %2198 = vmatpush3.msra.mxu1 %v2705_v4  ;;  %v3011_v41 = vand.u32 4294901760, %v1166_v37 }
  0xf3   :  { %2156 = vmatprep.subr.mxu0 %v2496_v0  ;;  %2199 = vmatprep.subr.mxu1 %v2496_v0 }
  0xf4   :  { %2157 = vmatpush3.msra.mxu0 %v2637_v46  ;;  %2200 = vmatpush3.msra.mxu1 %v2716_v8  ;;  %v1163_v46 = vld [vmem:[%s3398_s5 + $0x40] sm:$0xff] }
  0xf5   :  { %2158 = vmatprep.subr.mxu0 %v2496_v0  ;;  %2201 = vmatprep.subr.mxu1 %v2496_v0 }
  0xf6   :  { %2159 = vmatpush3.msra.mxu0 %v2648_v50  ;;  %2202 = vmatpush3.msra.mxu1 %v2730_v15  ;;  %v3025_v50 = vsub.f32 %v1169_v29, %v2995_v32 }
  0xf7   :  { %2160 = vmatprep.subr.mxu0 %v2496_v0  ;;  %2203 = vmatprep.subr.mxu1 %v2496_v0 }
  0xf8   :  { %2161 = vmatpush3.msra.mxu0 %v2703_v3  ;;  %2204 = vmatpush3.msra.mxu1 %v2745_v26 }
  0xf9   :  { %2162 = vmatprep.subr.mxu0 %v2496_v0  ;;  %2205 = vmatprep.subr.mxu1 %v2496_v0 }
  0xfa   :  { %2163 = vmatpush3.msra.mxu0 %v2714_v7  ;;  %2206 = vmatpush3.msra.mxu1 %v2755_v39 }
  0xfb   :  { %2164 = vmatprep.subr.mxu0 %v2496_v0  ;;  %2207 = vmatprep.subr.mxu1 %v2496_v0 }
  0xfc   :  { %2165 = vmatpush3.msra.mxu0 %v2728_v14  ;;  %2208 = vmatpush3.msra.mxu1 %v2771_v52 }
  0xfd   :  { %2166 = vmatprep.subr.mxu0 %v2496_v0  ;;  %2209 = vmatprep.subr.mxu1 %v2496_v0 }
  0xfe   :  { %2167 = vmatpush3.msra.mxu0 %v2742_v25  ;;  %2210 = vmatpush3.msra.mxu1 %v2784_v60 }
  0xff   :  { %2168 = vmatprep.subr.mxu0 %v2496_v0  ;;  %2212 = vmatmul.mubr.f32.vlgmr.msra.gmra.mxu1 %v596_v34  ;;  %v1328_v34 = vand.u32 4294901760, %v3109_v19 }
 0x100   :  { %2249 = vmatprep.subr.mxu1 %v2496_v0  ;;  %2169 = vmatpush3.msra.mxu0 %v2759_v43 }
 0x101   :  { %2250 = vmatpush3.msra.mxu1 %v2558_v9  ;;  %2170 = vmatprep.subr.mxu0 %v2496_v0  ;;  %v3412_v9 = vand.u32 4294901760, %v2728_v14 }
 0x102   :  { %2251 = vmatprep.subr.mxu1 %v2496_v0  ;;  %2171 = vmatpush3.msra.mxu0 %v2769_v51 }
 0x103   :  { %2252 = vmatpush3.msra.mxu1 %v2564_v13  ;;  %2172 = vmatprep.subr.mxu0 %v2496_v0  ;;  %v3413_v13 = vand.u32 4294901760, %v2742_v25 }
 0x104   :  { %2253 = vmatprep.subr.mxu1 %v2496_v0  ;;  %2173 = vmatpush3.msra.mxu0 %v2782_v59 }
 0x105   :  { %2254 = vmatpush3.msra.mxu1 %v2573_v18  ;;  %2174 = vmatprep.subr.mxu0 %v2496_v0  ;;  %v3415_v18 = vand.u32 4294901760, %v2769_v51 }
 0x106   :  { %2255 = vmatprep.subr.mxu1 %v2496_v0  ;;  %2175 = vmatpush3.msra.mxu0 %v2797_v2 }
 0x107   :  { %2176 = vmatprep.mubr.msk.f32.mxu0 %vm2497_vm2, %v2496_v0  ;;  %2256 = vmatpush3.msra.mxu1 %v2581_v23  ;;  %v3417_v23 = vand.u32 4294901760, %v2797_v2 }
 0x108   :  { %2177 = vmatmul.mubr.f32.vlgmr.msra.gmra.mxu0 %v2820_v30  ;;  %2214 = vmatprep.subr.mxu0 %v2496_v0 }
 0x109   :  { %2257 = vmatprep.subr.mxu1 %v2496_v0  ;;  %2215 = vmatpush3.msra.mxu0 %v607_v28 }
 0x10a   :  { %2258 = vmatpush3.msra.mxu1 %v2583_v24  ;;  %2216 = vmatprep.subr.mxu0 %v2496_v0  ;;  %v1170_v24 = vld [vmem:[%s3398_s5 + $0x78] sm:$0xff] }
 0x10b   :  { %2259 = vmatprep.subr.mxu1 %v2496_v0  ;;  %2217 = vmatpush3.msra.mxu0 %v614_v31  ;;  %v2987_v28 = vand.u32 4294901760, %v1170_v24 }
 0x10c   :  { %2260 = vmatpush3.msra.mxu1 %v2599_v33  ;;  %2218 = vmatprep.subr.mxu0 %v2496_v0  ;;  %v1168_v33 = vld [vmem:[%s3398_s5 + $0x68] sm:$0xff] }
 0x10d   :  { %2261 = vmatprep.subr.mxu1 %v2496_v0  ;;  %2219 = vmatpush3.msra.mxu0 %v621_v36  ;;  %v2993_v31 = vsub.f32 %v1170_v24, %v2987_v28  ;;  %v1167_v36 = vld [vmem:[%s3398_s5 + $0x60] sm:$0xff] }
 0x10e   :  { %2262 = vmatpush3.msra.mxu1 %v2615_v38  ;;  %2220 = vmatprep.subr.mxu0 %v2496_v0  ;;  %v3007_v38 = vand.u32 4294901760, %v1168_v33 }
 0x10f   :  { %2263 = vmatprep.subr.mxu1 %v2496_v0  ;;  %2221 = vmatpush3.msra.mxu0 %v628_v40  ;;  %v3009_v40 = vand.u32 4294901760, %v1167_v36 }
 0x110   :  { %2264 = vmatpush3.msra.mxu1 %v2627_v42  ;;  %2222 = vmatprep.subr.mxu0 %v2496_v0  ;;  %v1165_v42 = vld [vmem:[%s3398_s5 + $0x50] sm:$0xff] }
 0x111   :  { %2265 = vmatprep.subr.mxu1 %v2496_v0  ;;  %2223 = vmatpush3.msra.mxu0 %v635_v45  ;;  %v1164_v45 = vld [vmem:[%s3398_s5 + $0x48] sm:$0xff]  ;;  %v3036_v3 = vsub.f32 %v1167_v36, %v3009_v40 }
 0x112   :  { %2266 = vmatpush3.msra.mxu1 %v2697_v1  ;;  %2224 = vmatprep.subr.mxu0 %v2496_v0  ;;  %v3033_v1 = vsub.f32 %v1168_v33, %v3007_v38 }
 0x113   :  { %2267 = vmatprep.subr.mxu1 %v2496_v0  ;;  %2225 = vmatpush3.msra.mxu0 %v642_v49  ;;  %v1272_v49 = vand.u32 4294901760, %v2993_v31 }
 0x114   :  { %2268 = vmatpush3.msra.mxu1 %v2705_v4  ;;  %2226 = vmatprep.subr.mxu0 %v2496_v0  ;;  %v3039_v4 = vsub.f32 %v1166_v37, %v3011_v41 }
 0x115   :  { %2269 = vmatprep.subr.mxu1 %v2496_v0  ;;  %2227 = vmatpush3.msra.mxu0 %v649_v53  ;;  %v3028_v53 = vand.u32 4294901760, %v1165_v42  ;;  %v1273_v7 = vsub.f32 %v2993_v31, %v1272_v49 }
 0x116   :  { %2270 = vmatpush3.msra.mxu1 %v2716_v8  ;;  %2228 = vmatprep.subr.mxu0 %v2496_v0  ;;  %v1279_v8 = vand.u32 4294901760, %v3025_v50  ;;  %v1300_v25 = vand.u32 4294901760, %v3039_v4 }
 0x117   :  { %2271 = vmatprep.subr.mxu1 %v2496_v0  ;;  %2229 = vmatpush3.msra.mxu0 %v656_v56  ;;  %v3030_v56 = vand.u32 4294901760, %v1164_v45 }
 0x118   :  { %2272 = vmatpush3.msra.mxu1 %v2730_v15  ;;  %2230 = vmatprep.subr.mxu0 %v2496_v0  ;;  %v1286_v15 = vand.u32 4294901760, %v3033_v1 }
 0x119   :  { %2273 = vmatprep.subr.mxu1 %v2496_v0  ;;  %2231 = vmatpush3.msra.mxu0 %v663_v6  ;;  %v3042_v6 = vand.u32 4294901760, %v1163_v46  ;;  %v3053_v14 = vsub.f32 %v1164_v45, %v3030_v56 }
 0x11a   :  { %2274 = vmatpush3.msra.mxu1 %v2745_v26  ;;  %2232 = vmatprep.subr.mxu0 %v2496_v0  ;;  %v1274_v26 = vand.u32 4294901760, %v1273_v7 }
 0x11b   :  { %2275 = vmatprep.subr.mxu1 %v2496_v0  ;;  %2233 = vmatpush3.msra.mxu0 %v670_v12  ;;  %v3049_v12 = vsub.f32 %v1165_v42, %v3028_v53  ;;  %v3065_v51 = vsub.f32 %v1163_v46, %v3042_v6  ;;  %v1314_v63 = vand.u32 4294901760, %v3053_v14  ;;  %v1157_v42 = vld [vmem:[%s3398_s5 + $0x10] sm:$0xff] }
 0x11c   :  { %2276 = vmatpush3.msra.mxu1 %v2755_v39  ;;  %2234 = vmatprep.subr.mxu0 %v2496_v0  ;;  %v1280_v39 = vsub.f32 %v3025_v50, %v1279_v8 }
 0x11d   :  { %2277 = vmatprep.subr.mxu1 %v2496_v0  ;;  %2235 = vmatpush3.msra.mxu0 %v3412_v9  ;;  %v1307_v43 = vand.u32 4294901760, %v3049_v12  ;;  %v1321_v47 = vand.u32 4294901760, %v3065_v51  ;;  %v1315_v55 = vsub.f32 %v3053_v14, %v1314_v63  ;;  %v1159_v9 = vld [vmem:[%s3398_s5 + $0x20] sm:$0xff] }
 0x11e   :  { %2278 = vmatpush3.msra.mxu1 %v2771_v52  ;;  %2236 = vmatprep.subr.mxu0 %v2496_v0  ;;  %v1287_v52 = vsub.f32 %v3033_v1, %v1286_v15  ;;  %v1281_v59 = vand.u32 4294901760, %v1280_v39 }
 0x11f   :  { %2279 = vmatprep.subr.mxu1 %v2496_v0  ;;  %2237 = vmatpush3.msra.mxu0 %v3413_v13  ;;  %v1308_v44 = vsub.f32 %v3049_v12, %v1307_v43  ;;  %v1322_v62 = vsub.f32 %v3065_v51, %v1321_v47  ;;  %v1316_v11 = vand.u32 4294901760, %v1315_v55  ;;  %v1329_v13 = vsub.f32 %v3109_v19, %v1328_v34 }
 0x120   :  { %2280 = vmatpush3.msra.mxu1 %v2784_v60  ;;  %2281 = vmatprep.mubr.msk.f32.mxu1 %vm2497_vm2, %v2496_v0  ;;  %v1301_v60 = vsub.f32 %v3039_v4, %v1300_v25  ;;  %v1288_v2 = vand.u32 4294901760, %v1287_v52  ;;  %v1156_v52 = vld [vmem:[%s3398_s5 + $0x8] sm:$0xff] }
 0x121   :  { %2238 = vmatprep.subr.mxu0 %v2496_v0  ;;  %2282 = vmatmul.mubr.f32.vlgmr.msra.gmra.mxu1 %v2817_v21  ;;  %v1309_v61 = vand.u32 4294901760, %v1308_v44  ;;  %v1323_v30 = vand.u32 4294901760, %v1322_v62  ;;  %v1330_v24 = vand.u32 4294901760, %v1329_v13  ;;  %v1155_v44 = vld [vmem:[%s3398_s5] sm:$0xff] }
 0x122   :  { %2239 = vmatpush3.msra.mxu0 %v3414_v17  ;;  %2246 = vmatprep.mubr.msk.f32.mxu0 %vm2497_vm2, %v2496_v0  ;;  %v1302_v48 = vand.u32 4294901760, %v1301_v60  ;;  %v1335_v17 = vand.u32 4294901760, %v3121_v54 }
 0x123   :  { %2240 = vmatprep.subr.mxu0 %v2496_v0  ;;  %2319 = vmatprep.subr.mxu1 %v2496_v0 }
 0x124   :  { %2241 = vmatpush3.msra.mxu0 %v3415_v18  ;;  %2351 = vmatprep.mubr.msk.f32.mxu1 %vm2497_vm2, %v2496_v0  ;;  %v3136_v18 = vsub.f32 %v1160_v27, %v3123_v35  ;;  %v1336_v29 = vsub.f32 %v3121_v54, %v1335_v17 }
 0x125   :  { %2242 = vmatprep.subr.mxu0 %v2496_v0  ;;  %2320 = vmatpush3.msra.mxu1 %v1274_v26  ;;  %v3165_v26 = vand.u32 4294901760, %v1157_v42 }
 0x126   :  { %2243 = vmatpush3.msra.mxu0 %v3416_v22  ;;  %2321 = vmatprep.subr.mxu1 %v2496_v0  ;;  %v3138_v22 = vand.u32 4294901760, %v1159_v9  ;;  %v1342_v33 = vand.u32 4294901760, %v3136_v18  ;;  %v1337_v45 = vand.u32 4294901760, %v1336_v29 }
 0x127   :  { %2244 = vmatprep.subr.mxu0 %v2496_v0  ;;  %2322 = vmatpush3.msra.mxu1 %v1281_v59  ;;  %v3179_v60 = vsub.f32 %v1157_v42, %v3165_v26 }
 0x128   :  { %2245 = vmatpush3.msra.mxu0 %v3417_v23  ;;  %2323 = vmatprep.subr.mxu1 %v2496_v0  ;;  %v1158_v23 = vld [vmem:[%s3398_s5 + $0x18] sm:$0xff]  ;;  %v3151_v36 = vsub.f32 %v1159_v9, %v3138_v22  ;;  %v1343_v46 = vsub.f32 %v3136_v18, %v1342_v33 }
 0x129   :  { %2247 = vmatmul.mubr.f32.vlgmr.msra.gmra.mxu0 %v2817_v21  ;;  %2284 = vmatprep.subr.mxu0 %v2496_v0  ;;  %v1293_v21 = vand.u32 4294901760, %v3036_v3  ;;  %v3155_v37 = vand.u32 4294901760, %v1158_v23  ;;  %v3410_v55 = vand.u32 4294901760, %v3179_v60 }
 0x12a   :  { %2316 = vmatprep.mubr.msk.f32.mxu0 %vm2497_vm2, %v2496_v0  ;;  %2285 = vmatpush3.msra.mxu0 %v2987_v28  ;;  %v1349_v7 = vand.u32 4294901760, %v3151_v36 }
 0x12b   :  { %2286 = vmatprep.subr.mxu0 %v2496_v0  ;;  %v1294_v58 = vsub.f32 %v3036_v3, %v1293_v21  ;;  %2324 = vmatpush3.msra.mxu1 %v1288_v2  ;;  %v3169_v39 = vsub.f32 %v1158_v23, %v3155_v37  ;;  %v3181_v2 = vand.u32 4294901760, %v1156_v52  ;;  %v1364_v10 = vsub.f32 %v3179_v60, %v3410_v55 }
 0x12c   :  { %2287 = vmatpush3.msra.mxu0 %v2995_v32  ;;  %2325 = vmatprep.subr.mxu1 %v2496_v0  ;;  %v1350_v59 = vsub.f32 %v3151_v36, %v1349_v7 }
 0x12d   :  { %2288 = vmatprep.subr.mxu0 %v2496_v0  ;;  %v1295_v16 = vand.u32 4294901760, %v1294_v58  ;;  %v1344_v58 = vand.u32 4294901760, %v1343_v46  ;;  %v3192_v57 = vsub.f32 %v1156_v52, %v3181_v2  ;;  %v1365_v9 = vand.u32 4294901760, %v1364_v10  ;;  %v1826_v10 = vld [vmem:[%s3399_s4] ss:$0 sm:$0xff] }
 0x12e   :  { %2289 = vmatpush3.msra.mxu0 %v3007_v38 }
 0x12f   :  { %2290 = vmatprep.subr.mxu0 %v2496_v0  ;;  %2326 = vmatpush3.msra.mxu1 %v1295_v16  ;;  %v3411_v16 = vand.u32 4294901760, %v3169_v39 }
 0x130   :  { %2291 = vmatpush3.msra.mxu0 %v3009_v40  ;;  %2327 = vmatprep.subr.mxu1 %v2496_v0 }
 0x131   :  { %2292 = vmatprep.subr.mxu0 %v2496_v0  ;;  %2328 = vmatpush3.msra.mxu1 %v1302_v48  ;;  %v1351_v48 = vand.u32 4294901760, %v1350_v59  ;;  %v1357_v62 = vsub.f32 %v3169_v39, %v3411_v16 }
 0x132   :  { %2293 = vmatpush3.msra.mxu0 %v3011_v41  ;;  %2329 = vmatprep.subr.mxu1 %v2496_v0 }
 0x133   :  { %2294 = vmatprep.subr.mxu0 %v2496_v0  ;;  %2330 = vmatpush3.msra.mxu1 %v1309_v61  ;;  %v3194_v61 = vand.u32 4294901760, %v1155_v44 }
 0x134   :  { %2295 = vmatpush3.msra.mxu0 %v3028_v53  ;;  %2331 = vmatprep.subr.mxu1 %v2496_v0 }
 0x135   :  { %2296 = vmatprep.subr.mxu0 %v2496_v0  ;;  %2332 = vmatpush3.msra.mxu1 %v1316_v11  ;;  %v3409_v11 = vand.u32 4294901760, %v3192_v57  ;;  %v3207_v27 = vsub.f32 %v1155_v44, %v3194_v61 }
 0x136   :  { %2297 = vmatpush3.msra.mxu0 %v3030_v56  ;;  %2333 = vmatprep.subr.mxu1 %v2496_v0 }
 0x137   :  { %2298 = vmatprep.subr.mxu0 %v2496_v0  ;;  %2334 = vmatpush3.msra.mxu1 %v1323_v30  ;;  %v1358_v30 = vand.u32 4294901760, %v1357_v62  ;;  %v1371_v13 = vsub.f32 %v3192_v57, %v3409_v11  ;;  %v3408_v23 = vand.u32 4294901760, %v3207_v27 }
 0x138   :  { %2299 = vmatpush3.msra.mxu0 %v3042_v6  ;;  %2335 = vmatprep.subr.mxu1 %v2496_v0 }
 0x139   :  { %2300 = vmatprep.subr.mxu0 %v2496_v0  ;;  %2336 = vmatpush3.msra.mxu1 %v1330_v24  ;;  %v1372_v24 = vand.u32 4294901760, %v1371_v13  ;;  %v1378_v29 = vsub.f32 %v3207_v27, %v3408_v23 }
 0x13a   :  { %2301 = vmatpush3.msra.mxu0 %v3100_v5  ;;  %2337 = vmatprep.subr.mxu1 %v2496_v0 }
 0x13b   :  { %2302 = vmatprep.subr.mxu0 %v2496_v0  ;;  %2338 = vmatpush3.msra.mxu1 %v1337_v45  ;;  %v1379_v42 = vand.u32 4294901760, %v1378_v29 }
 0x13c   :  { %2303 = vmatpush3.msra.mxu0 %v3111_v20  ;;  %2339 = vmatprep.subr.mxu1 %v2496_v0 }
 0x13d   :  { %2304 = vmatprep.subr.mxu0 %v2496_v0  ;;  %2340 = vmatpush3.msra.mxu1 %v1344_v58 }
 0x13e   :  { %2305 = vmatpush3.msra.mxu0 %v3123_v35  ;;  %2341 = vmatprep.subr.mxu1 %v2496_v0 }
 0x13f   :  { %2306 = vmatprep.subr.mxu0 %v2496_v0  ;;  %2342 = vmatpush3.msra.mxu1 %v1351_v48 }
 0x140   :  { %2307 = vmatpush3.msra.mxu0 %v3138_v22  ;;  %2343 = vmatprep.subr.mxu1 %v2496_v0 }
 0x141   :  { %2308 = vmatprep.subr.mxu0 %v2496_v0  ;;  %2344 = vmatpush3.msra.mxu1 %v1358_v30 }
 0x142   :  { %2309 = vmatpush3.msra.mxu0 %v3155_v37  ;;  %2345 = vmatprep.subr.mxu1 %v2496_v0 }
 0x143   :  { %2310 = vmatprep.subr.mxu0 %v2496_v0  ;;  %2346 = vmatpush3.msra.mxu1 %v1365_v9 }
 0x144   :  { %2311 = vmatpush3.msra.mxu0 %v3165_v26  ;;  %2347 = vmatprep.subr.mxu1 %v2496_v0 }
 0x145   :  { %2312 = vmatprep.subr.mxu0 %v2496_v0  ;;  %2348 = vmatpush3.msra.mxu1 %v1372_v24 }
 0x146   :  { %2313 = vmatpush3.msra.mxu0 %v3181_v2  ;;  %2349 = vmatprep.subr.mxu1 %v2496_v0 }
 0x147   :  { %2314 = vmatprep.subr.mxu0 %v2496_v0  ;;  %2350 = vmatpush3.msra.mxu1 %v1379_v42 }
 0x148   :  { %2315 = vmatpush3.msra.mxu0 %v3194_v61  ;;  %2389 = vmatprep.subr.mxu1 %v2496_v0 }
 0x149   :  { %2354 = vmatprep.subr.mxu0 %v2496_v0 }
 0x19f   :  { %v751_v45 = vpop.f32.mrf.mxu1 }
 0x1a1   :  { %v2143_v46 = vpop.f32.mrf.mxu1 }
 0x1a7   :  { %v600_v52 = vpop.f32.mrf.mxu0 }
 0x1a8   :  { %v601_v30 = vadd.f32 %v1826_v10, %v600_v52 }
 0x1a9   :  { %v2108_v58 = vpop.f32.mrf.mxu0 }
 0x1aa   :  { %v752_v13 = vadd.f32 %v751_v45, %v601_v30 }
 0x1bf   :  { %v944_v59 = vpop.f32.mrf.mxu1 }
 0x1c1   :  { %v2213_v44 = vpop.f32.mrf.mxu1 }
 0x1c8   :  { %v855_v48 = vpop.f32.mrf.mxu0 }
 0x1c9   :  { %v856_v29 = vadd.f32 %v855_v48, %v752_v13 }
 0x1ca   :  { %v2178_v62 = vpop.f32.mrf.mxu0 }
 0x1cb   :  { %v945_v42 = vadd.f32 %v944_v59, %v856_v29 }
 0x1e1   :  { %v1150_v9 = vpop.f32.mrf.mxu1 }
 0x1e3   :  { %v2283_v24 = vpop.f32.mrf.mxu1 }
 0x1e9   :  { %v1063_v23 = vpop.f32.mrf.mxu0 }
 0x1ea   :  { %v1064_v11 = vadd.f32 %v1063_v23, %v945_v42 }
 0x1eb   :  { %v2248_v55 = vpop.f32.mrf.mxu0 }
 0x1ec   :  { %v1151_v46 = vadd.f32 %v1150_v9, %v1064_v11 }
 0x1ee   :  { %v1154_v16 = vmax.f32 %v1151_v46, 0.0 }
 0x1f0   :  { %v3227_v58 = vand.u32 4294901760, %v1154_v16 }
 0x1f2   :  { %v3230_v44 = vsub.f32 %v1154_v16, %v3227_v58  ;;  %2352 = vmatmul.mubr.f32.vlgmr.msra.gmra.mxu1 %v3227_v58 }
 0x1f3   :  { %2390 = vmatpush3.msra.mxu1 %v2987_v28  ;;  %2421 = vmatprep.mubr.msk.f32.mxu1 %vm2497_vm2, %v2496_v0 }
 0x1f4   :  { %v1261_v45 = vand.u32 4294901760, %v3230_v44  ;;  %2391 = vmatprep.subr.mxu1 %v2496_v0 }
 0x1f5   :  { %2392 = vmatpush3.msra.mxu1 %v2995_v32 }
 0x1f6   :  { %2393 = vmatprep.subr.mxu1 %v2496_v0  ;;  %v1262_v55 = vsub.f32 %v3230_v44, %v1261_v45 }
 0x1f7   :  { %2394 = vmatpush3.msra.mxu1 %v3007_v38 }
 0x1f8   :  { %2395 = vmatprep.subr.mxu1 %v2496_v0  ;;  %v1263_v16 = vand.u32 4294901760, %v1262_v55 }
 0x1f9   :  { %2396 = vmatpush3.msra.mxu1 %v3009_v40 }
 0x1fa   :  { %2397 = vmatprep.subr.mxu1 %v2496_v0  ;;  %2317 = vmatmul.mubr.f32.vlgmr.msra.gmra.mxu0 %v1263_v16 }
 0x1fb   :  { %2355 = vmatpush3.msra.mxu0 %v2993_v31  ;;  %2398 = vmatpush3.msra.mxu1 %v3011_v41  ;;  %v3419_v31 = vand.u32 4294901760, %v3179_v60 }
 0x1fc   :  { %2356 = vmatprep.subr.mxu0 %v2496_v0  ;;  %2399 = vmatprep.subr.mxu1 %v2496_v0 }
 0x1fd   :  { %2357 = vmatpush3.msra.mxu0 %v3025_v50  ;;  %2400 = vmatpush3.msra.mxu1 %v3028_v53 }
 0x1fe   :  { %2358 = vmatprep.subr.mxu0 %v2496_v0  ;;  %2401 = vmatprep.subr.mxu1 %v2496_v0 }
 0x1ff   :  { %2359 = vmatpush3.msra.mxu0 %v3033_v1  ;;  %2402 = vmatpush3.msra.mxu1 %v3030_v56 }
 0x200   :  { %2360 = vmatprep.subr.mxu0 %v2496_v0  ;;  %2403 = vmatprep.subr.mxu1 %v2496_v0 }
 0x201   :  { %2361 = vmatpush3.msra.mxu0 %v3036_v3  ;;  %2404 = vmatpush3.msra.mxu1 %v3042_v6 }
 0x202   :  { %2362 = vmatprep.subr.mxu0 %v2496_v0  ;;  %2405 = vmatprep.subr.mxu1 %v2496_v0 }
 0x203   :  { %2363 = vmatpush3.msra.mxu0 %v3039_v4  ;;  %2406 = vmatpush3.msra.mxu1 %v3100_v5  ;;  %v1827_v4 = vld [vmem:[%s3400_s6] ss:$0 sm:$0xff] }
 0x204   :  { %2364 = vmatprep.subr.mxu0 %v2496_v0  ;;  %2407 = vmatprep.subr.mxu1 %v2496_v0 }
 0x205   :  { %2365 = vmatpush3.msra.mxu0 %v3049_v12  ;;  %2408 = vmatpush3.msra.mxu1 %v3111_v20 }
 0x206   :  { %2366 = vmatprep.subr.mxu0 %v2496_v0  ;;  %2409 = vmatprep.subr.mxu1 %v2496_v0 }
 0x207   :  { %2367 = vmatpush3.msra.mxu0 %v3053_v14  ;;  %2410 = vmatpush3.msra.mxu1 %v3123_v35 }
 0x208   :  { %2368 = vmatprep.subr.mxu0 %v2496_v0  ;;  %2411 = vmatprep.subr.mxu1 %v2496_v0 }
 0x209   :  { %2369 = vmatpush3.msra.mxu0 %v3065_v51  ;;  %2412 = vmatpush3.msra.mxu1 %v3138_v22 }
 0x20a   :  { %2370 = vmatprep.subr.mxu0 %v2496_v0  ;;  %2413 = vmatprep.subr.mxu1 %v2496_v0 }
 0x20b   :  { %2371 = vmatpush3.msra.mxu0 %v3109_v19  ;;  %2414 = vmatpush3.msra.mxu1 %v3155_v37 }
 0x20c   :  { %2372 = vmatprep.subr.mxu0 %v2496_v0  ;;  %2415 = vmatprep.subr.mxu1 %v2496_v0 }
 0x20d   :  { %2373 = vmatpush3.msra.mxu0 %v3121_v54  ;;  %2416 = vmatpush3.msra.mxu1 %v3165_v26 }
 0x20e   :  { %2374 = vmatprep.subr.mxu0 %v2496_v0  ;;  %2417 = vmatprep.subr.mxu1 %v2496_v0 }
 0x20f   :  { %2375 = vmatpush3.msra.mxu0 %v3136_v18  ;;  %2418 = vmatpush3.msra.mxu1 %v3181_v2 }
 0x210   :  { %2376 = vmatprep.subr.mxu0 %v2496_v0  ;;  %2419 = vmatprep.subr.mxu1 %v2496_v0 }
 0x211   :  { %2377 = vmatpush3.msra.mxu0 %v3151_v36  ;;  %2420 = vmatpush3.msra.mxu1 %v3194_v61 }
 0x212   :  { %2378 = vmatprep.subr.mxu0 %v2496_v0  ;;  %2422 = vmatmul.mubr.f32.vlgmr.msra.gmra.mxu1 %v1261_v45 }
 0x213   :  { %2459 = vmatprep.subr.mxu1 %v2496_v0  ;;  %2379 = vmatpush3.msra.mxu0 %v3169_v39 }
 0x214   :  { %2460 = vmatpush3.msra.mxu1 %v2987_v28  ;;  %2380 = vmatprep.subr.mxu0 %v2496_v0  ;;  %v3418_v28 = vand.u32 4294901760, %v3169_v39 }
 0x215   :  { %2461 = vmatprep.subr.mxu1 %v2496_v0  ;;  %2381 = vmatpush3.msra.mxu0 %v3179_v60 }
 0x216   :  { %2462 = vmatpush3.msra.mxu1 %v2995_v32  ;;  %2382 = vmatprep.subr.mxu0 %v2496_v0  ;;  %v3420_v32 = vand.u32 4294901760, %v3192_v57 }
 0x217   :  { %2463 = vmatprep.subr.mxu1 %v2496_v0  ;;  %2383 = vmatpush3.msra.mxu0 %v3192_v57 }
 0x218   :  { %2464 = vmatpush3.msra.mxu1 %v3007_v38  ;;  %2384 = vmatprep.subr.mxu0 %v2496_v0  ;;  %v3421_v38 = vand.u32 4294901760, %v3207_v27 }
 0x219   :  { %2465 = vmatprep.subr.mxu1 %v2496_v0  ;;  %2385 = vmatpush3.msra.mxu0 %v3207_v27 }
 0x21a   :  { %2386 = vmatprep.mubr.msk.f32.mxu0 %vm2497_vm2, %v2496_v0  ;;  %2466 = vmatpush3.msra.mxu1 %v3009_v40 }
 0x21b   :  { %2387 = vmatmul.mubr.f32.vlgmr.msra.gmra.mxu0 %v3230_v44  ;;  %2424 = vmatprep.subr.mxu0 %v2496_v0 }
 0x21c   :  { %2467 = vmatprep.subr.mxu1 %v2496_v0  ;;  %2425 = vmatpush3.msra.mxu0 %v1272_v49 }
 0x21d   :  { %2468 = vmatpush3.msra.mxu1 %v3011_v41  ;;  %2426 = vmatprep.subr.mxu0 %v2496_v0 }
 0x21e   :  { %2469 = vmatprep.subr.mxu1 %v2496_v0  ;;  %2427 = vmatpush3.msra.mxu0 %v1279_v8 }
 0x21f   :  { %2470 = vmatpush3.msra.mxu1 %v3028_v53  ;;  %2428 = vmatprep.subr.mxu0 %v2496_v0 }
 0x220   :  { %2471 = vmatprep.subr.mxu1 %v2496_v0  ;;  %2429 = vmatpush3.msra.mxu0 %v1286_v15 }
 0x221   :  { %2472 = vmatpush3.msra.mxu1 %v3030_v56  ;;  %2430 = vmatprep.subr.mxu0 %v2496_v0 }
 0x222   :  { %2473 = vmatprep.subr.mxu1 %v2496_v0  ;;  %2431 = vmatpush3.msra.mxu0 %v1293_v21 }
 0x223   :  { %2474 = vmatpush3.msra.mxu1 %v3042_v6  ;;  %2432 = vmatprep.subr.mxu0 %v2496_v0 }
 0x224   :  { %2475 = vmatprep.subr.mxu1 %v2496_v0  ;;  %2433 = vmatpush3.msra.mxu0 %v1300_v25 }
 0x225   :  { %2476 = vmatpush3.msra.mxu1 %v3100_v5  ;;  %2434 = vmatprep.subr.mxu0 %v2496_v0 }
 0x226   :  { %2477 = vmatprep.subr.mxu1 %v2496_v0  ;;  %2435 = vmatpush3.msra.mxu0 %v1307_v43 }
 0x227   :  { %2478 = vmatpush3.msra.mxu1 %v3111_v20  ;;  %2436 = vmatprep.subr.mxu0 %v2496_v0 }
 0x228   :  { %2479 = vmatprep.subr.mxu1 %v2496_v0  ;;  %2437 = vmatpush3.msra.mxu0 %v1314_v63 }
 0x229   :  { %2480 = vmatpush3.msra.mxu1 %v3123_v35  ;;  %2438 = vmatprep.subr.mxu0 %v2496_v0 }
 0x22a   :  { %2481 = vmatprep.subr.mxu1 %v2496_v0  ;;  %2439 = vmatpush3.msra.mxu0 %v1321_v47 }
 0x22b   :  { %2482 = vmatpush3.msra.mxu1 %v3138_v22  ;;  %2440 = vmatprep.subr.mxu0 %v2496_v0 }
 0x22c   :  { %2483 = vmatprep.subr.mxu1 %v2496_v0  ;;  %2441 = vmatpush3.msra.mxu0 %v1328_v34 }
 0x22d   :  { %2484 = vmatpush3.msra.mxu1 %v3155_v37  ;;  %2442 = vmatprep.subr.mxu0 %v2496_v0 }
 0x22e   :  { %2485 = vmatprep.subr.mxu1 %v2496_v0  ;;  %2443 = vmatpush3.msra.mxu0 %v1335_v17 }
 0x22f   :  { %2486 = vmatpush3.msra.mxu1 %v3165_v26  ;;  %2444 = vmatprep.subr.mxu0 %v2496_v0 }
 0x230   :  { %2487 = vmatprep.subr.mxu1 %v2496_v0  ;;  %2445 = vmatpush3.msra.mxu0 %v1342_v33 }
 0x231   :  { %2488 = vmatpush3.msra.mxu1 %v3181_v2  ;;  %2446 = vmatprep.subr.mxu0 %v2496_v0 }
 0x232   :  { %2489 = vmatprep.subr.mxu1 %v2496_v0  ;;  %2447 = vmatpush3.msra.mxu0 %v1349_v7 }
 0x233   :  { %2490 = vmatpush3.msra.mxu1 %v3194_v61  ;;  %2491 = vmatprep.mubr.msk.f32.mxu1 %vm2497_vm2, %v2496_v0 }
 0x234   :  { %2448 = vmatprep.subr.mxu0 %v2496_v0  ;;  %2492 = vmatmul.mubr.f32.vlgmr.msra.gmra.mxu1 %v3227_v58 }
 0x235   :  { %2449 = vmatpush3.msra.mxu0 %v3418_v28  ;;  %2456 = vmatprep.mubr.msk.f32.mxu0 %vm2497_vm2, %v2496_v0 }
 0x236   :  { %2450 = vmatprep.subr.mxu0 %v2496_v0 }
 0x237   :  { %2451 = vmatpush3.msra.mxu0 %v3419_v31 }
 0x238   :  { %2452 = vmatprep.subr.mxu0 %v2496_v0 }
 0x239   :  { %2453 = vmatpush3.msra.mxu0 %v3420_v32 }
 0x23a   :  { %2454 = vmatprep.subr.mxu0 %v2496_v0 }
 0x23b   :  { %2455 = vmatpush3.msra.mxu0 %v3421_v38 }
 0x23c   :  { %2457 = vmatmul.mubr.f32.vlgmr.msra.gmra.mxu0 %v3227_v58 }
 0x2b2   :  { %v1416_v40 = vpop.f32.mrf.mxu1 }
 0x2b4   :  { %v2353_v41 = vpop.f32.mrf.mxu1 }
 0x2ba   :  { %v1265_v49 = vpop.f32.mrf.mxu0 }
 0x2bb   :  { %v1266_v6 = vadd.f32 %v1827_v4, %v1265_v49 }
 0x2bc   :  { %v2318_v50 = vpop.f32.mrf.mxu0 }
 0x2bd   :  { %v1417_v0 = vadd.f32 %v1416_v40, %v1266_v6 }
 0x2d2   :  { %v1609_v53 = vpop.f32.mrf.mxu1 }
 0x2d4   :  { %v2423_v56 = vpop.f32.mrf.mxu1 }
 0x2db   :  { %v1520_v1 = vpop.f32.mrf.mxu0 }
 0x2dc   :  { %v1521_v14 = vadd.f32 %v1520_v1, %v1417_v0 }
 0x2dd   :  { %v2388_v3 = vpop.f32.mrf.mxu0 }
 0x2de   :  { %v1610_v15 = vadd.f32 %v1609_v53, %v1521_v14 }
 0x2f4   :  { %v1815_v8 = vpop.f32.mrf.mxu1 }
 0x2f6   :  { %v2493_v12 = vpop.f32.mrf.mxu1 }
 0x2fc   :  { %v1728_v21 = vpop.f32.mrf.mxu0 }
 0x2fd   :  { %v1729_v25 = vadd.f32 %v1728_v21, %v1610_v15 }
 0x2fe   :  { %v2458_v43 = vpop.f32.mrf.mxu0 }
 0x2ff   :  { %v1816_v51 = vadd.f32 %v1815_v8, %v1729_v25 }
 0x301   :  { %1820 = vst.msk [vmem:[%s3401_s7] sm:$0xff] %vm1819_vm3, %v1816_v51 }

</bundles_post_ra>
